<compile_context>
chip_gen: v7x
topology: tpu7x:2x2x1
jax: 0.10.0
libtpu: 0.0.40
codegen_flags: <defaults>
</compile_context>

<pallas_src>
import functools

import jax
import jax.numpy as jnp
from jax import lax
from jax.experimental import pallas as pl
from jax.experimental.pallas import tpu as pltpu

EXPANSION = 1  # PreActBlock (basic pre-activation block)


def _round_up(x, m):
    return (x + m - 1) // m * m


def _first_divisor(n, candidates):
    for c in candidates:
        if n % c == 0:
            return c
    return n


# ----------------------------------------------------------------------------
# Pallas GEMM (bf16 operands, f32 accumulation in the output block)
# ----------------------------------------------------------------------------
def _mm_kernel(a_ref, b_ref, o_ref):
    k = pl.program_id(2)

    @pl.when(k == 0)
    def _():
        o_ref[...] = jnp.zeros_like(o_ref)

    o_ref[...] += jnp.dot(a_ref[...], b_ref[...],
                          preferred_element_type=jnp.float32)


def _mm_res_kernel(a_ref, b_ref, r_ref, o_ref):
    """Same as _mm_kernel but adds a residual (shortcut) tensor on the last K step."""
    k = pl.program_id(2)

    @pl.when(k == 0)
    def _():
        o_ref[...] = jnp.zeros_like(o_ref)

    o_ref[...] += jnp.dot(a_ref[...], b_ref[...],
                          preferred_element_type=jnp.float32)

    @pl.when(k == pl.num_programs(2) - 1)
    def _():
        o_ref[...] += r_ref[...]


def matmul(a, b, residual=None):
    """C = A @ B (+ residual) via an M/N/K-tiled Pallas GEMM.

    A/B are fed to the MXU as bf16; accumulation is f32 directly in the output
    block (which stays resident across the K axis).
    """
    M, K = a.shape
    Kb, N = b.shape
    assert K == Kb

    # ---- adaptive tile / padding selection (no more blind pad-to-512 on K) ----
    if M <= 256:
        Mp = _round_up(M, 8)
        tm = Mp
    else:
        Mp = _round_up(M, 256)
        tm = 256

    Np = _round_up(N, 128)
    tn = Np if Np <= 256 else _first_divisor(Np, (256, 128))

    if K <= 128:
        Kp = _round_up(K, 8)       # single K step, minimal padding (e.g. 27 -> 32)
        tk = Kp
    else:
        Kp = _round_up(K, 128)
        tk = _first_divisor(Kp, (512, 384, 256, 128))

    a_p = a.astype(jnp.bfloat16)
    b_p = b.astype(jnp.bfloat16)
    if (Mp, Kp) != (M, K):
        a_p = jnp.pad(a_p, ((0, Mp - M), (0, Kp - K)))
    if (Kp, Np) != (K, N):
        b_p = jnp.pad(b_p, ((0, Kp - K), (0, Np - N)))

    grid = (Mp // tm, Np // tn, Kp // tk)
    in_specs = [pl.BlockSpec((tm, tk), lambda i, j, k: (i, k)),
                pl.BlockSpec((tk, tn), lambda i, j, k: (k, j))]
    operands = [a_p, b_p]
    kernel = _mm_kernel

    if residual is not None:
        r_p = residual.astype(jnp.float32)
        if (Mp, Np) != (M, N):
            r_p = jnp.pad(r_p, ((0, Mp - M), (0, Np - N)))
        in_specs.append(pl.BlockSpec((tm, tn), lambda i, j, k: (i, j)))
        operands.append(r_p)
        kernel = _mm_res_kernel

    out = pl.pallas_call(
        kernel,
        out_shape=jax.ShapeDtypeStruct((Mp, Np), jnp.float32),
        grid=grid,
        in_specs=in_specs,
        out_specs=pl.BlockSpec((tm, tn), lambda i, j, k: (i, j)),
        compiler_params=pltpu.CompilerParams(
            dimension_semantics=("parallel", "parallel", "arbitrary"),
            vmem_limit_bytes=48 * 1024 * 1024),   # <= v7x 64 MiB/TC physical VMEM
    )(*operands)

    if (Mp, Np) != (M, N):
        out = out[:M, :N]
    return out


# ----------------------------------------------------------------------------
# BatchNorm (+ReLU), tiled over channels with a parallel grid
# ----------------------------------------------------------------------------
def _bn_relu_kernel(x_ref, g_ref, b_ref, o_ref, *, eps, relu):
    x = x_ref[...]
    mean = jnp.mean(x, axis=0, keepdims=True)
    d = x - mean
    var = jnp.mean(d * d, axis=0, keepdims=True)   # biased var (PyTorch train BN)
    y = d * lax.rsqrt(var + eps) * g_ref[...] + b_ref[...]
    if relu:
        y = jnp.maximum(y, 0.0)
    o_ref[...] = y


def batchnorm2d(x, gamma, beta, *, relu=False, eps=1e-5):
    """Training-mode BatchNorm2d (+optional ReLU) on an NHWC tensor.

    The per-channel statistics are independent across channels, so the kernel
    is tiled over C in 128-lane blocks (parallel grid) instead of pulling the
    whole (N*H*W, C) activation into VMEM in one shot.
    """
    N, H, W, C = x.shape
    R = N * H * W
    x2 = x.reshape(R, C)
    ct = 128 if C % 128 == 0 else C
    y = pl.pallas_call(
        functools.partial(_bn_relu_kernel, eps=eps, relu=relu),
        out_shape=jax.ShapeDtypeStruct((R, C), jnp.float32),
        grid=(C // ct,),
        in_specs=[pl.BlockSpec((R, ct), lambda c: (0, c)),
                  pl.BlockSpec((1, ct), lambda c: (0, c)),
                  pl.BlockSpec((1, ct), lambda c: (0, c))],
        out_specs=pl.BlockSpec((R, ct), lambda c: (0, c)),
        compiler_params=pltpu.CompilerParams(
            dimension_semantics=("parallel",)),
    )(x2, gamma.reshape(1, C), beta.reshape(1, C))
    return y.reshape(N, H, W, C)


# ----------------------------------------------------------------------------
# Global average pool
# ----------------------------------------------------------------------------
def _avgpool_kernel(x_ref, o_ref):
    o_ref[...] = jnp.mean(x_ref[...], axis=1)


def global_avgpool(x):
    """AdaptiveAvgPool2d((1,1)) + flatten: NHWC -> (N, C)."""
    N, H, W, C = x.shape
    x3 = x.reshape(N, H * W, C)
    return pl.pallas_call(
        _avgpool_kernel,
        out_shape=jax.ShapeDtypeStruct((N, C), jnp.float32),
        grid=(1,),
        in_specs=[pl.BlockSpec((N, H * W, C), lambda i: (0, 0, 0))],
        out_specs=pl.BlockSpec((N, C), lambda i: (0, 0)),
    )(x3)


# ----------------------------------------------------------------------------
# LPCA head (mean-centering, W projections, Linear, trace loss)
# ----------------------------------------------------------------------------
def _lpca_head_kernel(x_ref, w_ref, lw_ref, lb_ref, out_ref, xf_ref, loss_ref):
    x = x_ref[...]                                        # (B, F) raw features
    mean = jnp.mean(x, axis=0, keepdims=True)             # mean_feat is None path
    xf = x - mean
    xf_ref[...] = xf

    Wm = w_ref[...]                                       # (h, F); nested_k == -1
    # hidden = x_feat @ W.T  -> (B, h)
    hidden = lax.dot_general(xf, Wm, (((1,), (1,)), ((), ())),
                             preferred_element_type=jnp.float32)
    # x_rec = hidden @ W     -> (B, F)
    x_rec = jnp.dot(hidden, Wm, preferred_element_type=jnp.float32)
    # logits = x_rec @ lin_w.T + lin_b
    logits = lax.dot_general(x_rec, lw_ref[...], (((1,), (1,)), ((), ())),
                             preferred_element_type=jnp.float32) + lb_ref[...]
    out_ref[...] = logits

    # trace(Cov - W^T W Cov) / B  ==  (||xf||_F^2 - ||xf W^T||_F^2) / B
    # (trace(W^T W xf^T xf) = trace((xf W^T)(xf W^T)^T) = ||hidden||_F^2)
    loss_ref[0, 0] = (jnp.sum(xf * xf) - jnp.sum(hidden * hidden)) \
        / jnp.float32(x.shape[0])


def lpca_head(x_raw, W, lin_w, lin_b):
    B, F = x_raw.shape
    h = W.shape[0]
    C = lin_w.shape[0]
    logits, x_feat, loss = pl.pallas_call(
        _lpca_head_kernel,
        out_shape=(jax.ShapeDtypeStruct((B, C), jnp.float32),
                   jax.ShapeDtypeStruct((B, F), jnp.float32),
                   jax.ShapeDtypeStruct((1, 1), jnp.float32)),
        grid=(1,),
        in_specs=[pl.BlockSpec((B, F), lambda i: (0, 0)),
                  pl.BlockSpec((h, F), lambda i: (0, 0)),
                  pl.BlockSpec((C, F), lambda i: (0, 0)),
                  pl.BlockSpec((1, C), lambda i: (0, 0))],
        out_specs=(pl.BlockSpec((B, C), lambda i: (0, 0)),
                   pl.BlockSpec((B, F), lambda i: (0, 0)),
                   pl.BlockSpec((1, 1), lambda i: (0, 0))),
    )(x_raw, W, lin_w, lin_b.reshape(1, C))
    return logits, x_feat, loss[0, 0]


# ----------------------------------------------------------------------------
# Conv via im2col (bf16 patches) + Pallas GEMM (optional fused residual add)
# ----------------------------------------------------------------------------
def _im2col(x, kh, kw, stride, padding):
    N, H, W, C = x.shape
    Ho = (H + 2 * padding - kh) // stride + 1
    Wo = (W + 2 * padding - kw) // stride + 1
    xp = jnp.pad(x, ((0, 0), (padding, padding), (padding, padding), (0, 0)))
    cols = []
    for i in range(kh):
        for j in range(kw):
            patch = xp[:, i::stride, j::stride, :][:, :Ho, :Wo, :]
            cols.append(patch)
    patches = jnp.concatenate(cols, axis=-1)               # (N, Ho, Wo, kh*kw*C)
    return patches.reshape(N * Ho * Wo, kh * kw * C), (N, Ho, Wo)


def conv2d(x, w, *, stride=1, padding=0, residual=None):
    """Cross-correlation conv (PyTorch semantics), NHWC in/out, no bias.

    `residual` (same shape as the conv output) is added inside the GEMM
    epilogue on the last K step (fused skip connection).
    """
    kh, kw, cin, cout = w.shape
    # Build patches in bf16 so the materialized im2col tensor costs half the
    # HBM bytes (GEMM operands are bf16 anyway).
    patches, (N, Ho, Wo) = _im2col(x.astype(jnp.bfloat16), kh, kw, stride, padding)
    res2 = None
    if residual is not None:
        res2 = residual.reshape(N * Ho * Wo, cout)
    y = matmul(patches, w.reshape(kh * kw * cin, cout), residual=res2)
    return y.reshape(N, Ho, Wo, cout)


# ----------------------------------------------------------------------------
# PreActResNet
# ----------------------------------------------------------------------------
def preact_block(x, p, stride):
    out = batchnorm2d(x, p["bn1_g"], p["bn1_b"], relu=True)
    if "sc_w" in p:
        shortcut = conv2d(out, p["sc_w"], stride=stride, padding=0)
    else:
        shortcut = x
    out = conv2d(out, p["conv1_w"], stride=stride, padding=1)
    out = batchnorm2d(out, p["bn2_g"], p["bn2_b"], relu=True)
    # residual add fused into the second conv's GEMM epilogue
    out = conv2d(out, p["conv2_w"], stride=1, padding=1, residual=shortcut)
    return out


def init_params(key, h_dim, num_blocks, num_classes):
    keys = iter(jax.random.split(key, 256))

    def conv_w(kh, kw, cin, cout):
        fan_in = kh * kw * cin
        return (jax.random.normal(next(keys), (kh, kw, cin, cout), jnp.float32)
                * (2.0 / fan_in) ** 0.5)

    def bn(c):
        g = 1.0 + 0.1 * jax.random.normal(next(keys), (c,), jnp.float32)
        b = 0.1 * jax.random.normal(next(keys), (c,), jnp.float32)
        return g, b

    params = {"conv1_w": conv_w(3, 3, 3, 64)}
    in_planes = 64
    layers = []
    for planes, nb, stride0 in zip((64, 128, 256, 512), num_blocks, (1, 2, 2, 2)):
        blocks = []
        strides = [stride0] + [1] * (nb - 1)
        for s in strides:
            p = {}
            p["bn1_g"], p["bn1_b"] = bn(in_planes)
            p["conv1_w"] = conv_w(3, 3, in_planes, planes)
            p["bn2_g"], p["bn2_b"] = bn(planes)
            p["conv2_w"] = conv_w(3, 3, planes, planes)
            if s != 1 or in_planes != planes * EXPANSION:
                p["sc_w"] = conv_w(1, 1, in_planes, planes * EXPANSION)
            blocks.append(p)
            in_planes = planes * EXPANSION
        layers.append(blocks)
    params["layers"] = layers

    feat_dim = 512 * EXPANSION
    params["bn_g"], params["bn_b"] = bn(feat_dim)
    params["lin_w"] = 0.02 * jax.random.normal(next(keys),
                                               (num_classes, feat_dim), jnp.float32)
    params["lin_b"] = 0.02 * jax.random.normal(next(keys),
                                               (num_classes,), jnp.float32)
    # orthogonal init for the LPCA projection W (h_dim, feat_dim)
    params["W"] = jax.nn.initializers.orthogonal()(next(keys),
                                                   (h_dim, feat_dim), jnp.float32)
    return params


def preact_resnet_forward(params, x_nchw):
    # NCHW (PyTorch) -> NHWC
    x = jnp.transpose(x_nchw, (0, 2, 3, 1)).astype(jnp.float32)
    out = conv2d(x, params["conv1_w"], stride=1, padding=1)
    layer_strides = (1, 2, 2, 2)
    for li, blocks in enumerate(params["layers"]):
        for bi, p in enumerate(blocks):
            s = layer_strides[li] if bi == 0 else 1
            out = preact_block(out, p, s)
    out = batchnorm2d(out, params["bn_g"], params["bn_b"], relu=True)
    x_feat_raw = global_avgpool(out)                       # (B, 512)
    logits, x_feat, lpca_loss = lpca_head(x_feat_raw, params["W"],
                                          params["lin_w"], params["lin_b"])
    # TODO(synk): nested_k != -1 masking path (torch.cuda mask buffers) is dead
    # at default init (nested_k == -1) and is not translated.
    return logits, x_feat_raw, x_feat, lpca_loss


if __name__ == "__main__":
    key = jax.random.PRNGKey(0)
    kx, kp = jax.random.split(key)

    H_DIM = 32
    NUM_BLOCKS = (1, 1, 1, 1)   # small PreActResNet (basic blocks, expansion=1)
    NUM_CLASSES = 10

    params = init_params(kp, H_DIM, NUM_BLOCKS, NUM_CLASSES)
    x = jax.random.normal(kx, (2, 3, 16, 16), jnp.float32)   # NCHW like PyTorch

    logits, x_feat_raw, x_feat, lpca_loss = preact_resnet_forward(params, x)
    jax.block_until_ready((logits, x_feat_raw, x_feat, lpca_loss))

    assert logits.shape == (2, NUM_CLASSES)
    assert x_feat_raw.shape == (2, 512 * EXPANSION)
    assert x_feat.shape == (2, 512 * EXPANSION)
    assert lpca_loss.shape == ()
    print("KERNEL_OK")
</pallas_src>

<mosaic_0001>
module attributes {stable_mosaic.version = 11 : i64} {
  func.func @_mm_kernel(%arg0: i32, %arg1: i32, %arg2: i32, %arg3: memref<256x32xbf16, #tpu.memory_space<vmem>>, %arg4: memref<32x128xbf16, #tpu.memory_space<vmem>>, %arg5: memref<256x128xf32, #tpu.memory_space<vmem>>) attributes {dimension_semantics = [#tpu.dimension_semantics<parallel>, #tpu.dimension_semantics<parallel>, #tpu.dimension_semantics<arbitrary>], iteration_bounds = array<i64: 2, 1, 1>, scalar_prefetch = 0 : i64, scratch_operands = 0 : i64, tpu.core_type = #tpu.core_type<tc>, window_params = [{transform_indices = @transform_0, window_bounds = array<i64: 256, 32>}, {transform_indices = @transform_1, window_bounds = array<i64: 32, 128>}, {transform_indices = @transform_2, window_bounds = array<i64: 256, 128>}]} {
    %c0_i32 = arith.constant 0 : i32
    %0 = arith.cmpi eq, %arg2, %c0_i32 : i32
    %1 = arith.extui %0 : i1 to i32
    %c0_i32_0 = arith.constant 0 : i32
    %2 = arith.cmpi ne, %1, %c0_i32_0 : i32
    scf.if %2 {
      %cst_8 = arith.constant 0.000000e+00 : f32
      %9 = vector.broadcast %cst_8 : f32 to vector<256x128xf32>
      %c0_9 = arith.constant 0 : index
      %c0_10 = arith.constant 0 : index
      %10 = vector.load %arg5[%c0_9, %c0_10] : memref<256x128xf32, #tpu.memory_space<vmem>>, vector<256x128xf32>
      tpu.vector_store %arg5[%c0_9, %c0_10], %9 {strides = array<i32>} : memref<256x128xf32, #tpu.memory_space<vmem>>, vector<256x128xf32>,
    } else {
    }
    %c0 = arith.constant 0 : index
    %c0_1 = arith.constant 0 : index
    %3 = vector.load %arg5[%c0, %c0_1] : memref<256x128xf32, #tpu.memory_space<vmem>>, vector<256x128xf32>
    %c0_2 = arith.constant 0 : index
    %c0_3 = arith.constant 0 : index
    %4 = vector.load %arg3[%c0_2, %c0_3] : memref<256x32xbf16, #tpu.memory_space<vmem>>, vector<256x32xbf16>
    %c0_4 = arith.constant 0 : index
    %c0_5 = arith.constant 0 : index
    %5 = vector.load %arg4[%c0_4, %c0_5] : memref<32x128xbf16, #tpu.memory_space<vmem>>, vector<32x128xbf16>
    %cst = arith.constant dense<0.000000e+00> : vector<256x128xf32>
    %6 = tpu.matmul %4, %5, %cst {dimension_numbers = #tpu.dot_dimension_numbers<[1], [0], [0], [1], [0, 0, 1, 1], [], []>} : vector<256x32xbf16>, vector<32x128xbf16>, vector<256x128xf32> -> vector<256x128xf32>
    %7 = arith.addf %3, %6 : vector<256x128xf32>
    %c0_6 = arith.constant 0 : index
    %c0_7 = arith.constant 0 : index
    %8 = vector.load %arg5[%c0_6, %c0_7] : memref<256x128xf32, #tpu.memory_space<vmem>>, vector<256x128xf32>
    tpu.vector_store %arg5[%c0_6, %c0_7], %7 {strides = array<i32>} : memref<256x128xf32, #tpu.memory_space<vmem>>, vector<256x128xf32>,
    return
  }
  func.func @transform_0(%arg0: i32, %arg1: i32, %arg2: i32) -> (i32, i32) {
    %c0_i32 = arith.constant 0 : i32
    return %arg0, %arg2 : i32, i32
  }
  func.func @transform_1(%arg0: i32, %arg1: i32, %arg2: i32) -> (i32, i32) {
    %c0_i32 = arith.constant 0 : i32
    return %arg2, %arg1 : i32, i32
  }
  func.func @transform_2(%arg0: i32, %arg1: i32, %arg2: i32) -> (i32, i32) {
    %c0_i32 = arith.constant 0 : i32
    return %arg0, %arg1 : i32, i32
  }
}

</mosaic_0001>

<bundles_post_ra>
// kernel: tpu_custom_call.1
= control target key start
LH: loop header
LB: loop body
LE: loop exit
PB: predicated region body
PF: predicated region fallthrough
CT: control target
= control target key end

     0   :  { %7 = vsyncpa [#allocation3], 0  ;;  %s1266_s0 = inlined_call_operand.vmem [shape: bf16[512,32], index: 0, kind: input, shape index: {}]   ;;  %s1267_s1 = inlined_call_operand.vmem [shape: bf16[32,128], index: 1, kind: input, shape index: {}]   ;;  %s1268_s2 = inlined_call_operand.hbm [shape: f32[512,128], index: 2, kind: output, shape index: {}]  }
   0x1   :  { %9 = vsyncpa [#allocation3 + $0x1], 0  ;;  %s1073_s9 = smov 0   ;;  %s1075_s10 = smov 0  }
   0x2   :  { %s1077_s11 = smov 0   ;;  %s1079_s12 = smov 0  }
   0x3   :  { %s1081_s13 = smov 0   ;;  %s1083_s14 = smov 0  }
   0x4 LB: > { %s792_s15 = sadd.s32 4294967295, %s1053_s14   ;;  %s793_s16 = sadd.s32 4294967294, %s1053_s14   ;;  %s1053_s14 = sphi %s1083_s14, %s15_s14   ;;  %s1049_s13 = sphi %s1081_s13, %s1275_s13   ;;  %s1045_s12 = sphi %s1079_s12, %s1274_s12   ;;  %s1041_s11 = sphi %s1077_s11, %s1273_s11   ;;  %s1037_s10 = sphi %s1075_s10, %s1272_s10   ;;  %s1033_s9 = sphi %s1073_s9, %s1271_s9  }
   0x5   : > { %s34_s17 = sadd.s32 1, %s1049_s13  ;;  %s99_s18 = sadd.s32 1, %s1041_s11 }
   0x6   : > { %p36_p0 = scmp.ge.s32.totalorder %s34_s17, 2  ;;  %p109_p1 = scmp.ne.s32.totalorder %s1041_s11, %s1037_s10 }
   0x7   : > { %p110_p2 = scmp.eq.s32.totalorder %s792_s15, 1  ;;  %p115_p3 = scmp.ne.s32.totalorder %s1037_s10, %s1033_s9 }
   0x8   : > { %s1277_s17 = smov (%p36_p0, %s34_s17), 0  ;;  %p116_p5 = scmp.eq.s32.totalorder %s793_s16, 1 }
   0x9   : > { %p1113_p4 = por %p110_p2, %p109_p1  ;;  %s94_s20 = ssub.s32 %s1049_s13, %s1277_s17 }
   0xa   : > { %p797_p6 = scmp.ge.s32.totalorder %s1053_s14, 1  ;;  %p97_p7 = scmp.eq.s32.totalorder %s94_s20, 0 }
   0xb   : > { %p1120_p8 = por %p116_p5, %p115_p3  ;;  %p158_p9 = scmp.lt.s32.totalorder %s1053_s14, 3 }
   0xc   : > { %s1126_s22 = scalar_select %p97_p7, %s1041_s11, %s99_s18  }
   0xd   : > { %p159_p10 = pnand %p797_p6, %p158_p9 }
   0xe   : > { %v957_v0 = vld [vmem:[%s1267_s1] sm:$0xff] (!%p159_p10)   ;;  %s799_s25 = sshll.u32 (!%p159_p10), %s1045_s12, 5  ;;  %v958_v1 = vld [vmem:[%s1267_s1 + $0x8] sm:$0xff] (!%p159_p10)   ;;  %vm407_vm0 = vcmask (!%p159_p10), 261120   ;;  %s188_s4 = sand.u32 (!%p159_p10), 1, %s1037_s10  }
   0xf   : > { %162 = sbr.rel (%p159_p10) target bundleno = 282 (0x11a), region = 28  ;;  %p192_p11 = scmp.lt.s32.totalorder (!%p159_p10), %s799_s25, 63  ;;  %859 = vmatprep.subr.bf16.mxu0 (!%p159_p10), %v957_v0  ;;  %895 = vmatprep.subr.bf16.mxu1 (!%p159_p10), %v957_v0 }
  0x10   : > { %860 = vmatpush3.bf16.msra.mxu0 (!%p159_p10), %v957_v0  ;;  %897 = vmatpush3.bf16.msra.mxu1 (!%p159_p10), %v957_v0  ;;  %s798_s5 = sshll.u32 (!%p159_p10), %s188_s4, 8  ;;  %s840_s7 = sshll.u32 (!%p159_p10), %s1045_s12, 12 }
  0x11   : > { %861 = vmatprep.subr.bf16.mxu0 (!%p159_p10), %v958_v1  ;;  %896 = vmatprep.subr.bf16.mxu1 (!%p159_p10), %v958_v1  ;;  %s1175_s6 = scalar_lea.vmem (!%p159_p10), [#allocation2], %s798_s5  ;;  %s1209_s18 = scalar_lea.hbm (!%p159_p10), %s1268_s2, %s840_s7 }
  0x12   : > { %s696_s8 = sshll.u32 (!%p159_p10), %s1175_s6, 4  ;;  %s1220_s12 = scalar_lea.sflag (!%p159_p10), [#allocation3], %s188_s4  ;;  %s1211_s8 = int_to_ptr.vmem [resolvable:$true] %s696_s8 }
  0x13   : > { %s975_s20 = scalar_lea.vmem (!%p159_p10), %s1211_s8, 4096  ;;  %s1055_s23 = smov (!%p159_p10), [#allocation2]  }
  0x14   : > { %862 = vmatpush3.bf16.msra.mxu0 (!%p159_p10), %v958_v1  ;;  %898 = vmatpush3.bf16.msra.mxu1 (!%p159_p10), %v958_v1  ;;  %p976_p12 = scmp.ne.s32.totalorder (!%p159_p10), %s1211_s8, %s975_s20  ;;  %s979_s24 = sshll.u32 (!%p159_p10), %s1055_s23, 4  ;;  %s980_s24 = int_to_ptr.vmem [resolvable:$false] %s979_s24 }
  0x15   : > { %p982_p1 = scmp.lt.s32.totalorder (!%p159_p10), %s1211_s8, %s980_s24 }
  0x16   : > { %s1279_s25 = smov (!%p192_p11, %s799_s25), 63  ;;  %p977_p13 = pnand %p976_p12, %p1113_p4 }
  0x17   : > { %s800_s28 = sshll.u32 %s1279_s25, 2  ;;  %s981_s25 = scalar_lea.vmem %s980_s24, 8192 }
  0x18   : > { %s1138_s3 = scalar_lea.vmem %s1266_s0, %s800_s28  ;;  %p978_p0 = pneg %p977_p13 }
  0x19   : > { %v959_v2 = vld [vmem:[%s1138_s3] sm:$0xff]   ;;  %v961_v4 = vld [vmem:[%s1138_s3 + $0x8] sm:$0xff]   ;;  %v963_v6 = vld [vmem:[%s1138_s3 + $0x10] sm:$0xff]   ;;  %p983_p2 = scmp.lt.s32.totalorder %s981_s25, %s975_s20 }
  0x1a   : > { %v960_v3 = vld [vmem:[%s1138_s3 + $0x40] sm:$0xff]   ;;  %863 = vmatprep.mubr.msk.bf16.mxu0 %vm407_vm0, %v959_v2  ;;  %v962_v5 = vld [vmem:[%s1138_s3 + $0x48] sm:$0xff]   ;;  %v964_v7 = vld [vmem:[%s1138_s3 + $0x50] sm:$0xff]  }
  0x1b   : > { %879 = vmatprep.mubr.msk.bf16.mxu1 %vm407_vm0, %v960_v3  ;;  %864 = vmatmul.mubr.msk.bf16.vlgmr.msra.gmra.mrb[0].mxu0 %vm407_vm0, %v961_v4  ;;  %v965_v8 = vld [vmem:[%s1138_s3 + $0x18] sm:$0xff]   ;;  %v967_v10 = vld [vmem:[%s1138_s3 + $0x20] sm:$0xff]   ;;  %v969_v12 = vld [vmem:[%s1138_s3 + $0x28] sm:$0xff]   ;;  %p984_p3 = por %p983_p2, %p982_p1 }
  0x1c   : > { %880 = vmatmul.mubr.msk.bf16.vlgmr.msra.gmra.mrb[0].mxu1 %vm407_vm0, %v962_v5  ;;  %867 = vmatprep.mubr.msk.bf16.mxu0 %vm407_vm0, %v963_v6  ;;  %v966_v9 = vld [vmem:[%s1138_s3 + $0x58] sm:$0xff]   ;;  %v968_v11 = vld [vmem:[%s1138_s3 + $0x60] sm:$0xff]   ;;  %v970_v13 = vld [vmem:[%s1138_s3 + $0x68] sm:$0xff]  }
  0x1d   : > { %883 = vmatprep.mubr.msk.bf16.mxu1 %vm407_vm0, %v964_v7  ;;  %v971_v14 = vld [vmem:[%s1138_s3 + $0x30] sm:$0xff]   ;;  %v973_v16 = vld [vmem:[%s1138_s3 + $0x38] sm:$0xff]   ;;  %p985_p5 = pnand %p984_p3, %p978_p0 }
  0x1e   : > { %v972_v15 = vld [vmem:[%s1138_s3 + $0x70] sm:$0xff]   ;;  %v974_v17 = vld [vmem:[%s1138_s3 + $0x78] sm:$0xff]  }
  0x23   : > { %868 = vmatmul.mubr.msk.bf16.gmra.mrb[4].mxu0 %vm407_vm0, %v965_v8 }
  0x24   : > { %884 = vmatmul.mubr.msk.bf16.gmra.mrb[4].mxu1 %vm407_vm0, %v966_v9  ;;  %871 = vmatprep.mubr.msk.bf16.mxu0 %vm407_vm0, %v967_v10 }
  0x25   : > { %887 = vmatprep.mubr.msk.bf16.mxu1 %vm407_vm0, %v968_v11 }
  0x2b   : > { %872 = vmatmul.mubr.msk.bf16.gmra.mrb[8].mxu0 %vm407_vm0, %v969_v12 }
  0x2c   : > { %888 = vmatmul.mubr.msk.bf16.gmra.mrb[8].mxu1 %vm407_vm0, %v970_v13  ;;  %875 = vmatprep.mubr.msk.bf16.mxu0 %vm407_vm0, %v971_v14 }
  0x2d   : > { %891 = vmatprep.mubr.msk.bf16.mxu1 %vm407_vm0, %v972_v15 }
  0x33   : > { %876 = vmatmul.mubr.msk.bf16.gmra.mrb[12].mxu0 %vm407_vm0, %v973_v16 }
  0x34   : > { %892 = vmatmul.mubr.msk.bf16.gmra.mrb[12].mxu1 %vm407_vm0, %v974_v17 }
  0xee   : > { %v865_v18 = vpop.f32.mrb[0].mxu0 }
  0xef   : > { %v881_v19 = vpop.f32.mrb[0].mxu1  ;;  %v490_v20 = vpop.f32.mrb[1].mxu0  ;;  %651 = vst [vmem:[%s1175_s6 + $0x10] sm:$0xff] %v865_v18 }
  0xf0   : > { %v554_v21 = vpop.f32.mrb[1].mxu1  ;;  %v866_v22 = vpop.f32.mrb[2].mxu0  ;;  %667 = vst [vmem:[%s1175_s6 + $0x90] sm:$0xff] %v881_v19  ;;  %649 = vst [vmem:[%s1175_s6] sm:$0xff] %v490_v20 }
  0xf1   : > { %v882_v23 = vpop.f32.mrb[2].mxu1  ;;  %v493_v24 = vpop.f32.mrb[3].mxu0  ;;  %665 = vst [vmem:[%s1175_s6 + $0x80] sm:$0xff] %v554_v21  ;;  %652 = vst [vmem:[%s1175_s6 + $0x18] sm:$0xff] %v866_v22 }
  0xf2   : > { %v557_v25 = vpop.f32.mrb[3].mxu1  ;;  %668 = vst [vmem:[%s1175_s6 + $0x98] sm:$0xff] %v882_v23  ;;  %650 = vst [vmem:[%s1175_s6 + $0x8] sm:$0xff] %v493_v24 }
  0xf3   : > { %666 = vst [vmem:[%s1175_s6 + $0x88] sm:$0xff] %v557_v25 }
  0xf6   : > { %v869_v26 = vpop.f32.mrb[4].mxu0 }
  0xf7   : > { %v885_v27 = vpop.f32.mrb[4].mxu1  ;;  %v506_v28 = vpop.f32.mrb[5].mxu0  ;;  %655 = vst [vmem:[%s1175_s6 + $0x30] sm:$0xff] %v869_v26 }
  0xf8   : > { %v570_v29 = vpop.f32.mrb[5].mxu1  ;;  %v870_v30 = vpop.f32.mrb[6].mxu0  ;;  %671 = vst [vmem:[%s1175_s6 + $0xb0] sm:$0xff] %v885_v27  ;;  %653 = vst [vmem:[%s1175_s6 + $0x20] sm:$0xff] %v506_v28 }
  0xf9   : > { %v886_v31 = vpop.f32.mrb[6].mxu1  ;;  %v509_v32 = vpop.f32.mrb[7].mxu0  ;;  %669 = vst [vmem:[%s1175_s6 + $0xa0] sm:$0xff] %v570_v29  ;;  %656 = vst [vmem:[%s1175_s6 + $0x38] sm:$0xff] %v870_v30 }
  0xfa   : > { %v573_v33 = vpop.f32.mrb[7].mxu1  ;;  %672 = vst [vmem:[%s1175_s6 + $0xb8] sm:$0xff] %v886_v31  ;;  %654 = vst [vmem:[%s1175_s6 + $0x28] sm:$0xff] %v509_v32 }
  0xfb   : > { %670 = vst [vmem:[%s1175_s6 + $0xa8] sm:$0xff] %v573_v33 }
  0xfe   : > { %v873_v34 = vpop.f32.mrb[8].mxu0 }
  0xff   : > { %v889_v35 = vpop.f32.mrb[8].mxu1  ;;  %v522_v36 = vpop.f32.mrb[9].mxu0  ;;  %659 = vst [vmem:[%s1175_s6 + $0x50] sm:$0xff] %v873_v34 }
 0x100   : > { %v586_v37 = vpop.f32.mrb[9].mxu1  ;;  %v874_v38 = vpop.f32.mrb[10].mxu0  ;;  %675 = vst [vmem:[%s1175_s6 + $0xd0] sm:$0xff] %v889_v35  ;;  %657 = vst [vmem:[%s1175_s6 + $0x40] sm:$0xff] %v522_v36 }
 0x101   : > { %v890_v39 = vpop.f32.mrb[10].mxu1  ;;  %v525_v40 = vpop.f32.mrb[11].mxu0  ;;  %673 = vst [vmem:[%s1175_s6 + $0xc0] sm:$0xff] %v586_v37  ;;  %660 = vst [vmem:[%s1175_s6 + $0x58] sm:$0xff] %v874_v38 }
 0x102   : > { %v589_v41 = vpop.f32.mrb[11].mxu1  ;;  %676 = vst [vmem:[%s1175_s6 + $0xd8] sm:$0xff] %v890_v39  ;;  %658 = vst [vmem:[%s1175_s6 + $0x48] sm:$0xff] %v525_v40 }
 0x103   : > { %674 = vst [vmem:[%s1175_s6 + $0xc8] sm:$0xff] %v589_v41 }
 0x106   : > { %v877_v42 = vpop.f32.mrb[12].mxu0 }
 0x107   : > { %v893_v43 = vpop.f32.mrb[12].mxu1  ;;  %v538_v44 = vpop.f32.mrb[13].mxu0  ;;  %663 = vst [vmem:[%s1175_s6 + $0x70] sm:$0xff] %v877_v42 }
 0x108   : > { %v602_v45 = vpop.f32.mrb[13].mxu1  ;;  %v878_v46 = vpop.f32.mrb[14].mxu0  ;;  %679 = vst [vmem:[%s1175_s6 + $0xf0] sm:$0xff] %v893_v43  ;;  %661 = vst [vmem:[%s1175_s6 + $0x60] sm:$0xff] %v538_v44 }
 0x109   : > { %v894_v47 = vpop.f32.mrb[14].mxu1  ;;  %v541_v48 = vpop.f32.mrb[15].mxu0  ;;  %677 = vst [vmem:[%s1175_s6 + $0xe0] sm:$0xff] %v602_v45  ;;  %664 = vst [vmem:[%s1175_s6 + $0x78] sm:$0xff] %v878_v46 }
 0x10a   : > { %v605_v49 = vpop.f32.mrb[15].mxu1  ;;  %680 = vst [vmem:[%s1175_s6 + $0xf8] sm:$0xff] %v894_v47  ;;  %662 = vst [vmem:[%s1175_s6 + $0x68] sm:$0xff] %v541_v48 }
 0x10b   : > { %678 = vst [vmem:[%s1175_s6 + $0xe8] sm:$0xff] %v605_v49 }
 0x10c   : > { %988 = shalt.err (!%p985_p5)
}
 0x10d   : > { %s989_s26 = scalar_lea.hbm %s1209_s18, 4096  ;;  %s993_s29 = scalar_lea.hbm %s1268_s2, 8192 }
 0x10e   : > { %p990_p6 = scmp.ne.s32.totalorder %s1209_s18, %s989_s26  ;;  %p994_p10 = scmp.lt.u32.totalorder %s1209_s18, %s1268_s2 }
 0x10f   : > { %p995_p11 = scmp.lt.u32.totalorder %s993_s29, %s989_s26  ;;  %p997_p13 = scmp.lt.u32.totalorder %s989_s26, %s1209_s18 }
 0x110   : > { %p991_p7 = pnand %p990_p6, %p1113_p4 }
 0x111   : > { %p996_p12 = por %p995_p11, %p994_p10 }
 0x112   : > { %p992_p9 = pneg %p991_p7 }
 0x113   : > { %p998_p0 = por %p997_p13, %p996_p12 }
 0x115   : > { %p999_p1 = pnand %p998_p0, %p992_p9 }
 0x117   : > { %1002 = shalt.err (!%p999_p1)
}
 0x118   : > { %s1056_s4 = smov 128   ;;  %s1057_s5 = smov 8  }
 0x119   : > { %899 = dma.vmem_to_hbm [thread:$0]  (%p1113_p4), %s1211_s8, 4096, %s1209_s18, %s1220_s12, %s1056_s4, %s1056_s4, %s1057_s5  }
 0x11a PF: > { %p905_p2 = scmp.ge.s32.totalorder %s1053_s14, 2  ;;  %s711_s6 = sand.u32 1, %s1033_s9  }
 0x11b   : > { %s712_s7 = scalar_lea.sflag [#allocation3], %s711_s6 }
 0x11c   : > { %p902_p3 = pnand %p905_p2, %p1120_p8 }
 0x11e   : > { %1028 = dma.done.wait (!%p902_p3), %s712_s7, 4096  }
 0x11f   : > { %1030 = vsyncadd (!%p902_p3), %s712_s7, 4294963200  ;;  %s15_s14 = sadd.s32 1, %s1053_s14   ;;  %s1271_s9 = smov %s1037_s10 }
 0x120   : > { %p12_p5 = scmp.ge.s32.totalorder %s15_s14, 4   ;;  %s1272_s10 = smov %s1041_s11 }
 0x121   : > { %s1273_s11 = smov %s1126_s22  ;;  %s1274_s12 = smov %s1049_s13 }
 0x122   : > { %s1275_s13 = smov %s1277_s17  ;;  %14 = sbr.rel (!%p12_p5) target bundleno = 4 (0x4), region = 70 }
 0x129   :  { %717 = vsyncpa [#allocation3], 1 }
 0x12a   :  { %719 = vsyncpa [#allocation3 + $0x1], 1 }

</bundles_post_ra>
